<compile_context>
chip_gen: v5e
topology: v5e:2x2
jax: 0.10.0
libtpu: 0.0.40
codegen_flags: <defaults>
</compile_context>

<pallas_src>
import jax
import jax.numpy as jnp
from jax import lax
from jax.experimental import pallas as pl
from jax.experimental.pallas import tpu as pltpu


def _round_up(x: int, m: int) -> int:
    return ((x + m - 1) // m) * m


def _nconv_kernel_shared_A(x_ref, a_ref, o_ref):
    # x_ref: (Vp, T)   a_ref: (Vp, Wp)   o_ref: (Wp, T)
    # out[w, t] = sum_v a[v, w] * x[v, t]  -> contract dim 0 of both operands.
    o = lax.dot_general(a_ref[...], x_ref[...], (((0,), (0,)), ((), ())),
                        preferred_element_type=jnp.float32)
    o_ref[...] = o.astype(o_ref.dtype)


def _nconv_kernel_batched_A(x_ref, a_ref, o_ref):
    # x_ref: (1, Vp, T)   a_ref: (1, Vp, Wp)   o_ref: (1, Wp, T)
    o = lax.dot_general(a_ref[0], x_ref[0], (((0,), (0,)), ((), ())),
                        preferred_element_type=jnp.float32)
    o_ref[0] = o.astype(o_ref.dtype)


def _nconv_shared(x, A, lane_tile):
    N, C, V, L = x.shape
    _, W = A.shape
    dtype = x.dtype

    F = N * C * L                                   # fused lane extent
    Vp = _round_up(V, 8)
    Wp = _round_up(W, 8)
    T = min(lane_tile, _round_up(F, 128))           # lane tile (multiple of 128)
    Fp = _round_up(F, T)

    # (N, C, V, L) -> (V, N*C*L) lane-dense slab, padded once outside the kernel.
    xs = jnp.transpose(x, (2, 0, 1, 3)).reshape(V, F)
    xs = jnp.pad(xs, ((0, Vp - V), (0, Fp - F)))
    Ap = jnp.pad(A, ((0, Vp - V), (0, Wp - W)))

    out_p = pl.pallas_call(
        _nconv_kernel_shared_A,
        out_shape=jax.ShapeDtypeStruct((Wp, Fp), dtype),
        grid=(Fp // T,),
        in_specs=[
            pl.BlockSpec((Vp, T), lambda j: (0, j)),
            pl.BlockSpec((Vp, Wp), lambda j: (0, 0)),   # A resident in VMEM
        ],
        out_specs=pl.BlockSpec((Wp, T), lambda j: (0, j)),
        compiler_params=pltpu.CompilerParams(
            dimension_semantics=("parallel",)),
    )(xs, Ap)

    out = out_p[:W, :F].reshape(W, N, C, L)
    return jnp.transpose(out, (1, 2, 0, 3))             # (N, C, W, L)


def _nconv_batched(x, A, lane_tile):
    N, C, V, L = x.shape
    _, _, W = A.shape
    dtype = x.dtype

    F = C * L                                       # fused lane extent per batch
    Vp = _round_up(V, 8)
    Wp = _round_up(W, 8)
    T = min(lane_tile, _round_up(F, 128))
    Fp = _round_up(F, T)

    # (N, C, V, L) -> (N, V, C*L) slab; the A-changing axis (n) stays outermost
    # in the grid so A[n] is fetched once per n, not once per grid step.
    xs = jnp.transpose(x, (0, 2, 1, 3)).reshape(N, V, F)
    xs = jnp.pad(xs, ((0, 0), (0, Vp - V), (0, Fp - F)))
    Ap = jnp.pad(A, ((0, 0), (0, Vp - V), (0, Wp - W)))

    out_p = pl.pallas_call(
        _nconv_kernel_batched_A,
        out_shape=jax.ShapeDtypeStruct((N, Wp, Fp), dtype),
        grid=(N, Fp // T),
        in_specs=[
            pl.BlockSpec((1, Vp, T), lambda n, j: (n, 0, j)),
            pl.BlockSpec((1, Vp, Wp), lambda n, j: (n, 0, 0)),
        ],
        out_specs=pl.BlockSpec((1, Wp, T), lambda n, j: (n, 0, j)),
        compiler_params=pltpu.CompilerParams(
            dimension_semantics=("parallel", "parallel")),
    )(xs, Ap)

    out = out_p[:, :W, :F].reshape(N, W, C, L)
    return jnp.transpose(out, (0, 2, 1, 3))              # (N, C, W, L)


def nconv(x, A, *, lane_tile=512):
    """Pallas equivalent of the PyTorch nconv.forward.

    x: (N, C, V, L); A: (V, W) or (N, V, W).  Returns (N, C, W, L).
    lane_tile: tile of the fused lane axis (rounded to a multiple of 128).
    """
    # Make dtype promotion explicit (avoid surprise f32 upcast inside VMEM).
    dtype = jnp.result_type(x.dtype, A.dtype)
    x = x.astype(dtype)
    A = A.astype(dtype)
    lane_tile = max(128, _round_up(int(lane_tile), 128))

    if A.ndim == 2:
        assert A.shape[0] == x.shape[2]
        return _nconv_shared(x, A, lane_tile)
    else:
        assert A.shape[0] == x.shape[0] and A.shape[1] == x.shape[2]
        return _nconv_batched(x, A, lane_tile)


if __name__ == "__main__":
    key = jax.random.PRNGKey(0)
    kx, ka2, ka3 = jax.random.split(key, 3)

    # Small shapes consistent with the module: N=2, C=4, V=16 nodes, L=8 seq.
    N, C, V, W, L = 2, 4, 16, 16, 8
    x = jax.random.normal(kx, (N, C, V, L), dtype=jnp.float32)
    A2 = jax.random.normal(ka2, (V, W), dtype=jnp.float32)       # shared adjacency
    A3 = jax.random.normal(ka3, (N, V, W), dtype=jnp.float32)    # batched adjacency

    # --- 2D adjacency path: einsum('ncvl,vw->ncwl') ---
    out2 = jax.block_until_ready(nconv(x, A2))
    ref2 = jnp.einsum('ncvl,vw->ncwl', x, A2)
    assert out2.shape == (N, C, W, L)
    assert jnp.allclose(out2, ref2, atol=1e-5, rtol=1e-5)

    # --- 3D adjacency path: einsum('ncvl,nvw->ncwl') ---
    out3 = jax.block_until_ready(nconv(x, A3))
    ref3 = jnp.einsum('ncvl,nvw->ncwl', x, A3)
    assert out3.shape == (N, C, W, L)
    assert jnp.allclose(out3, ref3, atol=1e-5, rtol=1e-5)

    print("KERNEL_OK")
</pallas_src>

<mosaic_0001>
module attributes {stable_mosaic.version = 11 : i64} {
  func.func @_nconv_kernel_shared_A(%arg0: i32, %arg1: memref<16x128xf32, #tpu.memory_space<vmem>>, %arg2: memref<16x16xf32, #tpu.memory_space<vmem>>, %arg3: memref<16x128xf32, #tpu.memory_space<vmem>>) attributes {dimension_semantics = [#tpu.dimension_semantics<parallel>], iteration_bounds = array<i64: 1>, scalar_prefetch = 0 : i64, scratch_operands = 0 : i64, tpu.core_type = #tpu.core_type<tc>, window_params = [{transform_indices = @transform_0, window_bounds = array<i64: 16, 128>}, {pipeline_mode = #tpu.pipeline_mode<synchronous>, transform_indices = @transform_1, window_bounds = array<i64: 16, 16>}, {transform_indices = @transform_2, window_bounds = array<i64: 16, 128>}]} {
    %c0 = arith.constant 0 : index
    %c0_0 = arith.constant 0 : index
    %0 = vector.load %arg2[%c0, %c0_0] : memref<16x16xf32, #tpu.memory_space<vmem>>, vector<16x16xf32>
    %c0_1 = arith.constant 0 : index
    %c0_2 = arith.constant 0 : index
    %1 = vector.load %arg1[%c0_1, %c0_2] : memref<16x128xf32, #tpu.memory_space<vmem>>, vector<16x128xf32>
    %cst = arith.constant dense<0.000000e+00> : vector<16x128xf32>
    %2 = tpu.matmul %0, %1, %cst {dimension_numbers = #tpu.dot_dimension_numbers<[0], [0], [1], [1], [0, 1, 1, 1], [], []>} : vector<16x16xf32>, vector<16x128xf32>, vector<16x128xf32> -> vector<16x128xf32>
    %c0_3 = arith.constant 0 : index
    %c0_4 = arith.constant 0 : index
    %3 = vector.load %arg3[%c0_3, %c0_4] : memref<16x128xf32, #tpu.memory_space<vmem>>, vector<16x128xf32>
    tpu.vector_store %arg3[%c0_3, %c0_4], %2 {strides = array<i32>} : memref<16x128xf32, #tpu.memory_space<vmem>>, vector<16x128xf32>,
    return
  }
  func.func @transform_0(%arg0: i32) -> (i32, i32) {
    %c0_i32 = arith.constant 0 : i32
    %c0_i32_0 = arith.constant 0 : i32
    return %c0_i32, %arg0 : i32, i32
  }
  func.func @transform_1(%arg0: i32) -> (i32, i32) {
    %c0_i32 = arith.constant 0 : i32
    %c0_i32_0 = arith.constant 0 : i32
    %c0_i32_1 = arith.constant 0 : i32
    return %c0_i32, %c0_i32_0 : i32, i32
  }
  func.func @transform_2(%arg0: i32) -> (i32, i32) {
    %c0_i32 = arith.constant 0 : i32
    %c0_i32_0 = arith.constant 0 : i32
    return %c0_i32, %arg0 : i32, i32
  }
}

</mosaic_0001>

<bundles_post_ra>
// kernel: tpu_custom_call.1
= control target key start
LH: loop header
LB: loop body
LE: loop exit
PB: predicated region body
PF: predicated region fallthrough
CT: control target
= control target key end

     0   :  { %7 = vsyncpa [#allocation3], 0  ;;  %s258_s0 = inlined_call_operand.hbm [shape: f32[16,128], index: 0, kind: input, shape index: {}]   ;;  %s259_s1 = inlined_call_operand.hbm [shape: f32[16,16], index: 1, kind: input, shape index: {}]   ;;  %s260_s2 = inlined_call_operand.hbm [shape: f32[16,128], index: 2, kind: output, shape index: {}]  }
   0x1   :  { %8 = vsyncpa [#allocation6], 0 }
   0x2   :  { %9 = vsyncpa [#allocation4], 0  ;;  %s14_s11 = sshll.u32 %s258_s0, 4  ;;  %s220_s12 = smov [#allocation2]   ;;  %s15_s11 = int_to_ptr.hbm [resolvable:$true] %s14_s11 }
   0x3   :  { %s16_s13 = sshll.u32 %s220_s12, 4  ;;  %s27_s16 = sshll.u32 %s259_s1, 4  ;;  %s17_s13 = int_to_ptr.vmem [resolvable:$true] %s16_s13  ;;  %s28_s16 = int_to_ptr.hbm [resolvable:$true] %s27_s16 }
   0x4   :  { %s221_s17 = smov 128   ;;  %s222_s18 = smov 8  }
   0x5   :  { %22 = dma.hbm_to_vmem [thread:$0]  %s15_s11, 256, %s17_s13, [#allocation3], %s221_s17, %s221_s17, %s222_s18  }
   0x6   :  { %s223_s19 = smov [#allocation5]  }
   0x7   :  { %s29_s20 = sshll.u32 %s223_s19, 4  ;;  %s30_s20 = int_to_ptr.vmem [resolvable:$true] %s29_s20 }
   0x8   :  { %35 = dma.hbm_to_vmem [thread:$0]  %s28_s16, 256, %s30_s20, [#allocation6], %s221_s17, %s221_s17, %s222_s18  }
   0x9   :  { %214 = dma.done.wait [#allocation3], 256  }
   0xa   :  { %215 = vsyncadd [#allocation3], 4294967040 }
   0xb   :  { %216 = dma.done.wait [#allocation6], 256  }
   0xc   :  { %217 = vsyncadd [#allocation6], 4294967040  ;;  %v44_v0 = vld [vmem:[#allocation5] sm:$0xff]  ;;  %v47_v1 = vld [vmem:[#allocation2 + $0x8] sm:$0xff]  ;;  %vm80_vm0 = vcmask 130048   ;;  %s224_s0 = smov [#allocation7]  }
   0xd   :  { %48 = vxpose.xlu0.b32.start [1/2] (short) (narrow) %v44_v0, 16  ;;  %101 = vmatpush.msra.mxu0 %v47_v1  ;;  %v46_v2 = vld [vmem:[#allocation2] sm:$0xff]  ;;  %v45_v3 = vld [vmem:[#allocation5 + $0x8] sm:$0xff]  ;;  %s116_s1 = sshll.u32 %s224_s0, 4  ;;  %s118_s23 = sshll.u32 %s260_s2, 4  ;;  %s117_s1 = int_to_ptr.vmem [resolvable:$true] %s116_s1  ;;  %s119_s23 = int_to_ptr.hbm [resolvable:$true] %s118_s23 }
   0xe   :  { %134 = vmatpush.msra.mxu1 %v47_v1 }
   0xf   :  { %102 = vmatpush.msra.mxu0 %v46_v2 }
  0x10   :  { %135 = vmatpush.msra.mxu1 %v46_v2 }
  0x15   :  { %49 = vxpose.xlu0.b32.end [2/2] (short) (narrow) %v45_v3, 16 }
  0xb1   :  { %v64_v4 = vpop.trf.xlu0 }
  0xb2   :  { %132 = vmatmul.msk.f32.vlgmr.msra.gmra.mxu0 %vm80_vm0, %v64_v4 }
  0xb9   :  { %v65_v5 = vpop.trf.xlu0 }
  0xba   :  { %133 = vmatmul.msk.f32.vlgmr.msra.gmra.mxu1 %vm80_vm0, %v65_v5 }
 0x12f   :  { %v104_v6 = vpop.f32.mrf.mxu0 }
 0x130   :  { %110 = vst [vmem:[#allocation7] sm:$0xff] %v104_v6 }
 0x137   :  { %v107_v7 = vpop.f32.mrf.mxu1 }
 0x138   :  { %111 = vst [vmem:[#allocation7 + $0x8] sm:$0xff] %v107_v7 }
 0x139   :  { %124 = dma.vmem_to_hbm [thread:$0]  %s117_s1, 256, %s119_s23, [#allocation4], %s221_s17, %s221_s17, %s222_s18  }
 0x13a   :  { %218 = dma.done.wait [#allocation4], 256  }
 0x13b   :  { %219 = vsyncadd [#allocation4], 4294967040 }
 0x13c   :  { %129 = vsyncpa [#allocation3], 1 }
 0x13d   :  { %130 = vsyncpa [#allocation6], 1 }
 0x13e   :  { %131 = vsyncpa [#allocation4], 1 }

</bundles_post_ra>
